<compile_context>
chip_gen: v7x
topology: tpu7x:2x2x1
jax: 0.10.0
libtpu: 0.0.40
codegen_flags: <defaults>
</compile_context>

<pallas_src>
import jax
import jax.numpy as jnp
from jax.experimental import pallas as pl
from jax.experimental.pallas import tpu as pltpu

LN_EPS = 1e-5  # torch.nn.LayerNorm default


def _layernorm(h, gamma, beta):
    mu = jnp.mean(h, axis=-1, keepdims=True)
    var = jnp.mean((h - mu) ** 2, axis=-1, keepdims=True)  # biased, like PyTorch
    return (h - mu) * jax.lax.rsqrt(var + LN_EPS) * gamma + beta


def block_kernel(x_ref,
                 w_proj_ref, b_proj_ref,
                 g1_ref, be1_ref,
                 w_fc_ref, b_fc_ref,
                 w_mp_ref, b_mp_ref,
                 g2_ref, be2_ref,
                 o_ref):
    x = x_ref[...]                      # (TILE_R, E) f32 rows (B and L folded together)
    mx = w_proj_ref.dtype               # matmul operand dtype (bf16 fast path or f32)

    # ---------------- Attention (n_head == 1) ----------------
    # softmax over the size-1 head axis is exactly 1.0, so attn_vec == c_proj(x);
    # the c_attn matmul, mask and softmax are dead and elided (see module header).
    attn = jnp.dot(x.astype(mx), w_proj_ref[...],
                   preferred_element_type=jnp.float32) + b_proj_ref[...]     # (TILE_R, E)
    # attn_dropout / resid_dropout: identity (eval mode)

    # ---------------- h = ln_1(x + attn)  (f32 statistics) ----------------
    h = _layernorm(x + attn, g1_ref[...], be1_ref[...])                      # (TILE_R, E)

    # ---------------- MLP ----------------
    h_fc = jnp.dot(h.astype(mx), w_fc_ref[...],
                   preferred_element_type=jnp.float32) + b_fc_ref[...]       # (TILE_R, 4E)
    h_act = jax.nn.gelu(h_fc, approximate=True)                              # f32 GELU (EUP)
    # mlp_dropout: identity (eval mode)
    h_mlp = jnp.dot(h_act.astype(mx), w_mp_ref[...],
                    preferred_element_type=jnp.float32) + b_mp_ref[...]      # (TILE_R, E)

    # ---------------- out = ln_2(h_mlp + x) ----------------
    o_ref[...] = _layernorm(h_mlp + x, g2_ref[...], be2_ref[...])


def gpt2_block(x, mask, params, *, use_bf16=True):
    """x: (B, L, E) float32, mask: (B, L, 1, 1).  Returns (B, L, E) float32."""
    B, L, E = x.shape
    (w_attn, b_attn, w_proj, b_proj,
     g1, be1, w_fc, b_fc, w_mp, b_mp, g2, be2) = params
    # c_attn and the mask are provably dead for n_head == 1 (softmax over a size-1
    # axis is identically 1); they never reach the kernel.
    del w_attn, b_attn, mask

    R = B * L
    x2 = x.reshape(R, E).astype(jnp.float32)

    # Row tiling: one big block for small problems; 256-row slabs (parallel grid)
    # for large ones.  Block dims are either multiples of 8 or the full array dim.
    if R <= 512:
        tile_r, r_pad = R, R
    else:
        tile_r = 256
        r_pad = -(-R // tile_r) * tile_r
        if r_pad != R:
            x2 = jnp.pad(x2, ((0, r_pad - R), (0, 0)))

    mx_dtype = jnp.bfloat16 if use_bf16 else jnp.float32
    wp = w_proj.astype(mx_dtype)
    wf = w_fc.astype(mx_dtype)
    wm = w_mp.astype(mx_dtype)

    act_spec = pl.BlockSpec((tile_r, E), lambda i: (i, 0))
    # Grid-invariant operands: whole array resident in VMEM, no double-buffering.
    vmem_full = pl.BlockSpec(memory_space=pltpu.MemorySpace.VMEM)

    out = pl.pallas_call(
        block_kernel,
        out_shape=jax.ShapeDtypeStruct((r_pad, E), jnp.float32),
        grid=(r_pad // tile_r,),
        in_specs=[act_spec] + [vmem_full] * 10,
        out_specs=act_spec,
        compiler_params=pltpu.CompilerParams(
            dimension_semantics=("parallel",),
            # Sized with headroom for v7x's 64 MiB physical VMEM; at GPT-2 sizes
            # (E=768, bf16 weights ~10 MiB, 256-row f32 tiles) this fits easily.
            vmem_limit_bytes=48 * 1024 * 1024,
        ),
    )(x2, wp, b_proj.astype(jnp.float32), g1, be1,
      wf, b_fc.astype(jnp.float32), wm, b_mp.astype(jnp.float32), g2, be2)

    return out[:R].reshape(B, L, E)


def reference_block(x, mask, params):
    """Pure-JAX reference mirroring the PyTorch forward exactly (n_head == 1, eval)."""
    (w_attn, b_attn, w_proj, b_proj,
     g1, be1, w_fc, b_fc, w_mp, b_mp, g2, be2) = params
    B, L, E = x.shape
    h_attn = (x @ w_attn + b_attn).reshape(B, L, 1, E)
    h_proj = (x @ w_proj + b_proj).reshape(B, L, 1, E)
    score = jnp.einsum('bhld,bhmd->bhml', h_attn, h_proj)      # (B, L, 1, 1)
    score = jnp.where(mask == 0, -1e9, score)                  # masked_fill
    prob = jax.nn.softmax(score, axis=-1)
    vec = jnp.einsum('bhml,bhmd->bhld', prob, h_proj).reshape(B, L, E)
    h = _layernorm(x + vec, g1, be1)
    h2 = jax.nn.gelu(h @ w_fc + b_fc, approximate=True) @ w_mp + b_mp
    return _layernorm(h2 + x, g2, be2)


if __name__ == "__main__":
    # Small shapes implied by the forward; n_head must be 1 (see module header).
    B, L, E, H = 2, 8, 32, 1
    key = jax.random.PRNGKey(0)
    keys = jax.random.split(key, 8)

    x = jax.random.normal(keys[0], (B, L, E), dtype=jnp.float32)
    # mask broadcastable onto attn_score (B, L, H, H); mix of 0/1 to exercise masked_fill
    mask = jax.random.bernoulli(keys[1], 0.8, (B, L, H, H)).astype(jnp.float32)

    s = 0.02
    params = (
        jax.random.normal(keys[2], (E, H * E), jnp.float32) * s,      # c_attn.W (in, out)
        jax.random.normal(keys[3], (1, H * E), jnp.float32) * s,      # c_attn.b
        jax.random.normal(keys[4], (E, H * E), jnp.float32) * s,      # c_proj.W
        jax.random.normal(keys[5], (1, H * E), jnp.float32) * s,      # c_proj.b
        jnp.ones((1, E), jnp.float32),                                # ln_1.gamma
        jnp.zeros((1, E), jnp.float32),                               # ln_1.beta
        jax.random.normal(keys[6], (E, 4 * E), jnp.float32) * s,      # mlp.c_fc.W
        jnp.zeros((1, 4 * E), jnp.float32),                           # mlp.c_fc.b
        jax.random.normal(keys[7], (4 * E, E), jnp.float32) * s,      # mlp.c_proj.W
        jnp.zeros((1, E), jnp.float32),                               # mlp.c_proj.b
        jnp.ones((1, E), jnp.float32),                                # ln_2.gamma
        jnp.zeros((1, E), jnp.float32),                               # ln_2.beta
    )

    ref = reference_block(x, mask, params)

    # Exact-precision check (f32 matmul operands) against the full-path reference.
    out_f32 = jax.block_until_ready(gpt2_block(x, mask, params, use_bf16=False))
    assert out_f32.shape == (B, L, E)
    assert jnp.allclose(out_f32, ref, atol=1e-4, rtol=1e-4), "f32 kernel mismatch vs JAX reference"

    # Fast path: bf16 MXU operands, f32 accumulation / LayerNorm / GELU.
    out = jax.block_until_ready(gpt2_block(x, mask, params, use_bf16=True))
    assert out.shape == (B, L, E)
    assert jnp.allclose(out, ref, atol=3e-2, rtol=3e-2), "bf16 kernel drift vs JAX reference too large"

    print("KERNEL_OK")
</pallas_src>

<mosaic_0001>
module attributes {stable_mosaic.version = 11 : i64} {
  func.func @block_kernel(%arg0: i32, %arg1: memref<16x32xf32, #tpu.memory_space<vmem>>, %arg2: memref<32x32xf32, #tpu.memory_space<vmem>>, %arg3: memref<1x32xf32, #tpu.memory_space<vmem>>, %arg4: memref<1x32xf32, #tpu.memory_space<vmem>>, %arg5: memref<1x32xf32, #tpu.memory_space<vmem>>, %arg6: memref<32x128xf32, #tpu.memory_space<vmem>>, %arg7: memref<1x128xf32, #tpu.memory_space<vmem>>, %arg8: memref<128x32xf32, #tpu.memory_space<vmem>>, %arg9: memref<1x32xf32, #tpu.memory_space<vmem>>, %arg10: memref<1x32xf32, #tpu.memory_space<vmem>>, %arg11: memref<1x32xf32, #tpu.memory_space<vmem>>, %arg12: memref<16x32xf32, #tpu.memory_space<vmem>>) attributes {dimension_semantics = [#tpu.dimension_semantics<parallel>], iteration_bounds = array<i64: 1>, scalar_prefetch = 0 : i64, scratch_operands = 0 : i64, tpu.core_type = #tpu.core_type<tc>, window_params = [{transform_indices = @transform_0, window_bounds = array<i64: 16, 32>}, {pipeline_mode = #tpu.pipeline_mode<synchronous>, transform_indices = @transform_1, window_bounds = array<i64: 32, 32>}, {pipeline_mode = #tpu.pipeline_mode<synchronous>, transform_indices = @transform_2, window_bounds = array<i64: 1, 32>}, {pipeline_mode = #tpu.pipeline_mode<synchronous>, transform_indices = @transform_3, window_bounds = array<i64: 1, 32>}, {pipeline_mode = #tpu.pipeline_mode<synchronous>, transform_indices = @transform_4, window_bounds = array<i64: 1, 32>}, {pipeline_mode = #tpu.pipeline_mode<synchronous>, transform_indices = @transform_5, window_bounds = array<i64: 32, 128>}, {pipeline_mode = #tpu.pipeline_mode<synchronous>, transform_indices = @transform_6, window_bounds = array<i64: 1, 128>}, {pipeline_mode = #tpu.pipeline_mode<synchronous>, transform_indices = @transform_7, window_bounds = array<i64: 128, 32>}, {pipeline_mode = #tpu.pipeline_mode<synchronous>, transform_indices = @transform_8, window_bounds = array<i64: 1, 32>}, {pipeline_mode = #tpu.pipeline_mode<synchronous>, transform_indices = @transform_9, window_bounds = array<i64: 1, 32>}, {pipeline_mode = #tpu.pipeline_mode<synchronous>, transform_indices = @transform_10, window_bounds = array<i64: 1, 32>}, {transform_indices = @transform_11, window_bounds = array<i64: 16, 32>}]} {
    %c0 = arith.constant 0 : index
    %c0_0 = arith.constant 0 : index
    %0 = vector.load %arg1[%c0, %c0_0] : memref<16x32xf32, #tpu.memory_space<vmem>>, vector<16x32xf32>
    %c0_1 = arith.constant 0 : index
    %c0_2 = arith.constant 0 : index
    %1 = vector.load %arg2[%c0_1, %c0_2] : memref<32x32xf32, #tpu.memory_space<vmem>>, vector<32x32xf32>
    %cst = arith.constant dense<0.000000e+00> : vector<16x32xf32>
    %2 = tpu.matmul %0, %1, %cst {dimension_numbers = #tpu.dot_dimension_numbers<[1], [0], [0], [1], [0, 0, 1, 1], [], []>} : vector<16x32xf32>, vector<32x32xf32>, vector<16x32xf32> -> vector<16x32xf32>
    %c0_3 = arith.constant 0 : index
    %c0_4 = arith.constant 0 : index
    %3 = vector.load %arg3[%c0_3, %c0_4] : memref<1x32xf32, #tpu.memory_space<vmem>>, vector<1x32xf32>
    %4 = vector.broadcast %3 : vector<1x32xf32> to vector<16x32xf32>
    %5 = arith.addf %2, %4 : vector<16x32xf32>
    %6 = arith.addf %0, %5 : vector<16x32xf32>
    %c0_5 = arith.constant 0 : index
    %c0_6 = arith.constant 0 : index
    %7 = vector.load %arg4[%c0_5, %c0_6] : memref<1x32xf32, #tpu.memory_space<vmem>>, vector<1x32xf32>
    %c0_7 = arith.constant 0 : index
    %c0_8 = arith.constant 0 : index
    %8 = vector.load %arg5[%c0_7, %c0_8] : memref<1x32xf32, #tpu.memory_space<vmem>>, vector<1x32xf32>
    %cst_9 = arith.constant dense<0.000000e+00> : vector<16xf32>
    %9 = vector.multi_reduction <add>, %6, %cst_9 [1] : vector<16x32xf32> to vector<16xf32>
    %10 = vector.shape_cast %9 : vector<16xf32> to vector<16x1xf32>
    %cst_10 = arith.constant 3.200000e+01 : f32
    %11 = vector.broadcast %cst_10 : f32 to vector<16x1xf32>
    %12 = arith.divf %10, %11 : vector<16x1xf32>
    %13 = vector.broadcast %12 : vector<16x1xf32> to vector<16x32xf32>
    %14 = arith.subf %6, %13 : vector<16x32xf32>
    %15 = arith.mulf %14, %14 : vector<16x32xf32>
    %cst_11 = arith.constant dense<0.000000e+00> : vector<16xf32>
    %16 = vector.multi_reduction <add>, %15, %cst_11 [1] : vector<16x32xf32> to vector<16xf32>
    %17 = vector.shape_cast %16 : vector<16xf32> to vector<16x1xf32>
    %cst_12 = arith.constant 3.200000e+01 : f32
    %18 = vector.broadcast %cst_12 : f32 to vector<16x1xf32>
    %19 = arith.divf %17, %18 : vector<16x1xf32>
    %20 = vector.broadcast %12 : vector<16x1xf32> to vector<16x32xf32>
    %21 = arith.subf %6, %20 : vector<16x32xf32>
    %cst_13 = arith.constant 9.99999974E-6 : f32
    %22 = vector.broadcast %cst_13 : f32 to vector<16x1xf32>
    %23 = arith.addf %19, %22 : vector<16x1xf32>
    %24 = math.rsqrt %23 : vector<16x1xf32>
    %25 = vector.broadcast %24 : vector<16x1xf32> to vector<16x32xf32>
    %26 = arith.mulf %21, %25 : vector<16x32xf32>
    %27 = vector.broadcast %7 : vector<1x32xf32> to vector<16x32xf32>
    %28 = arith.mulf %26, %27 : vector<16x32xf32>
    %29 = vector.broadcast %8 : vector<1x32xf32> to vector<16x32xf32>
    %30 = arith.addf %28, %29 : vector<16x32xf32>
    %c0_14 = arith.constant 0 : index
    %c0_15 = arith.constant 0 : index
    %31 = vector.load %arg6[%c0_14, %c0_15] : memref<32x128xf32, #tpu.memory_space<vmem>>, vector<32x128xf32>
    %cst_16 = arith.constant dense<0.000000e+00> : vector<16x128xf32>
    %32 = tpu.matmul %30, %31, %cst_16 {dimension_numbers = #tpu.dot_dimension_numbers<[1], [0], [0], [1], [0, 0, 1, 1], [], []>} : vector<16x32xf32>, vector<32x128xf32>, vector<16x128xf32> -> vector<16x128xf32>
    %c0_17 = arith.constant 0 : index
    %c0_18 = arith.constant 0 : index
    %33 = vector.load %arg7[%c0_17, %c0_18] : memref<1x128xf32, #tpu.memory_space<vmem>>, vector<1x128xf32>
    %34 = vector.broadcast %33 : vector<1x128xf32> to vector<16x128xf32>
    %35 = arith.addf %32, %34 : vector<16x128xf32>
    %36 = arith.mulf %35, %35 : vector<16x128xf32>
    %37 = arith.mulf %35, %36 : vector<16x128xf32>
    %cst_19 = arith.constant 4.471500e-02 : f32
    %38 = vector.broadcast %cst_19 : f32 to vector<16x128xf32>
    %39 = arith.mulf %38, %37 : vector<16x128xf32>
    %40 = arith.addf %35, %39 : vector<16x128xf32>
    %cst_20 = arith.constant 0.797884583 : f32
    %41 = vector.broadcast %cst_20 : f32 to vector<16x128xf32>
    %42 = arith.mulf %41, %40 : vector<16x128xf32>
    %43 = math.tanh %42 : vector<16x128xf32>
    %cst_21 = arith.constant 1.000000e+00 : f32
    %44 = vector.broadcast %cst_21 : f32 to vector<16x128xf32>
    %45 = arith.addf %44, %43 : vector<16x128xf32>
    %cst_22 = arith.constant 5.000000e-01 : f32
    %46 = vector.broadcast %cst_22 : f32 to vector<16x128xf32>
    %47 = arith.mulf %46, %45 : vector<16x128xf32>
    %48 = arith.mulf %35, %47 : vector<16x128xf32>
    %c0_23 = arith.constant 0 : index
    %c0_24 = arith.constant 0 : index
    %49 = vector.load %arg8[%c0_23, %c0_24] : memref<128x32xf32, #tpu.memory_space<vmem>>, vector<128x32xf32>
    %cst_25 = arith.constant dense<0.000000e+00> : vector<16x32xf32>
    %50 = tpu.matmul %48, %49, %cst_25 {dimension_numbers = #tpu.dot_dimension_numbers<[1], [0], [0], [1], [0, 0, 1, 1], [], []>} : vector<16x128xf32>, vector<128x32xf32>, vector<16x32xf32> -> vector<16x32xf32>
    %c0_26 = arith.constant 0 : index
    %c0_27 = arith.constant 0 : index
    %51 = vector.load %arg9[%c0_26, %c0_27] : memref<1x32xf32, #tpu.memory_space<vmem>>, vector<1x32xf32>
    %52 = vector.broadcast %51 : vector<1x32xf32> to vector<16x32xf32>
    %53 = arith.addf %50, %52 : vector<16x32xf32>
    %54 = arith.addf %53, %0 : vector<16x32xf32>
    %c0_28 = arith.constant 0 : index
    %c0_29 = arith.constant 0 : index
    %55 = vector.load %arg10[%c0_28, %c0_29] : memref<1x32xf32, #tpu.memory_space<vmem>>, vector<1x32xf32>
    %c0_30 = arith.constant 0 : index
    %c0_31 = arith.constant 0 : index
    %56 = vector.load %arg11[%c0_30, %c0_31] : memref<1x32xf32, #tpu.memory_space<vmem>>, vector<1x32xf32>
    %cst_32 = arith.constant dense<0.000000e+00> : vector<16xf32>
    %57 = vector.multi_reduction <add>, %54, %cst_32 [1] : vector<16x32xf32> to vector<16xf32>
    %58 = vector.shape_cast %57 : vector<16xf32> to vector<16x1xf32>
    %cst_33 = arith.constant 3.200000e+01 : f32
    %59 = vector.broadcast %cst_33 : f32 to vector<16x1xf32>
    %60 = arith.divf %58, %59 : vector<16x1xf32>
    %61 = vector.broadcast %60 : vector<16x1xf32> to vector<16x32xf32>
    %62 = arith.subf %54, %61 : vector<16x32xf32>
    %63 = arith.mulf %62, %62 : vector<16x32xf32>
    %cst_34 = arith.constant dense<0.000000e+00> : vector<16xf32>
    %64 = vector.multi_reduction <add>, %63, %cst_34 [1] : vector<16x32xf32> to vector<16xf32>
    %65 = vector.shape_cast %64 : vector<16xf32> to vector<16x1xf32>
    %cst_35 = arith.constant 3.200000e+01 : f32
    %66 = vector.broadcast %cst_35 : f32 to vector<16x1xf32>
    %67 = arith.divf %65, %66 : vector<16x1xf32>
    %68 = vector.broadcast %60 : vector<16x1xf32> to vector<16x32xf32>
    %69 = arith.subf %54, %68 : vector<16x32xf32>
    %cst_36 = arith.constant 9.99999974E-6 : f32
    %70 = vector.broadcast %cst_36 : f32 to vector<16x1xf32>
    %71 = arith.addf %67, %70 : vector<16x1xf32>
    %72 = math.rsqrt %71 : vector<16x1xf32>
    %73 = vector.broadcast %72 : vector<16x1xf32> to vector<16x32xf32>
    %74 = arith.mulf %69, %73 : vector<16x32xf32>
    %75 = vector.broadcast %55 : vector<1x32xf32> to vector<16x32xf32>
    %76 = arith.mulf %74, %75 : vector<16x32xf32>
    %77 = vector.broadcast %56 : vector<1x32xf32> to vector<16x32xf32>
    %78 = arith.addf %76, %77 : vector<16x32xf32>
    %c0_37 = arith.constant 0 : index
    %c0_38 = arith.constant 0 : index
    %79 = vector.load %arg12[%c0_37, %c0_38] : memref<16x32xf32, #tpu.memory_space<vmem>>, vector<16x32xf32>
    tpu.vector_store %arg12[%c0_37, %c0_38], %78 {strides = array<i32>} : memref<16x32xf32, #tpu.memory_space<vmem>>, vector<16x32xf32>,
    return
  }
  func.func @transform_0(%arg0: i32) -> (i32, i32) {
    %c0_i32 = arith.constant 0 : i32
    %c0_i32_0 = arith.constant 0 : i32
    return %arg0, %c0_i32 : i32, i32
  }
  func.func @transform_1(%arg0: i32) -> (i32, i32) {
    %c0_i32 = arith.constant 0 : i32
    %c0_i32_0 = arith.constant 0 : i32
    %c0_i32_1 = arith.constant 0 : i32
    return %c0_i32, %c0_i32_0 : i32, i32
  }
  func.func @transform_2(%arg0: i32) -> (i32, i32) {
    %c0_i32 = arith.constant 0 : i32
    %c0_i32_0 = arith.constant 0 : i32
    %c0_i32_1 = arith.constant 0 : i32
    return %c0_i32, %c0_i32_0 : i32, i32
  }
  func.func @transform_3(%arg0: i32) -> (i32, i32) {
    %c0_i32 = arith.constant 0 : i32
    %c0_i32_0 = arith.constant 0 : i32
    %c0_i32_1 = arith.constant 0 : i32
    return %c0_i32, %c0_i32_0 : i32, i32
  }
  func.func @transform_4(%arg0: i32) -> (i32, i32) {
    %c0_i32 = arith.constant 0 : i32
    %c0_i32_0 = arith.constant 0 : i32
    %c0_i32_1 = arith.constant 0 : i32
    return %c0_i32, %c0_i32_0 : i32, i32
  }
  func.func @transform_5(%arg0: i32) -> (i32, i32) {
    %c0_i32 = arith.constant 0 : i32
    %c0_i32_0 = arith.constant 0 : i32
    %c0_i32_1 = arith.constant 0 : i32
    return %c0_i32, %c0_i32_0 : i32, i32
  }
  func.func @transform_6(%arg0: i32) -> (i32, i32) {
    %c0_i32 = arith.constant 0 : i32
    %c0_i32_0 = arith.constant 0 : i32
    %c0_i32_1 = arith.constant 0 : i32
    return %c0_i32, %c0_i32_0 : i32, i32
  }
  func.func @transform_7(%arg0: i32) -> (i32, i32) {
    %c0_i32 = arith.constant 0 : i32
    %c0_i32_0 = arith.constant 0 : i32
    %c0_i32_1 = arith.constant 0 : i32
    return %c0_i32, %c0_i32_0 : i32, i32
  }
  func.func @transform_8(%arg0: i32) -> (i32, i32) {
    %c0_i32 = arith.constant 0 : i32
    %c0_i32_0 = arith.constant 0 : i32
    %c0_i32_1 = arith.constant 0 : i32
    return %c0_i32, %c0_i32_0 : i32, i32
  }
  func.func @transform_9(%arg0: i32) -> (i32, i32) {
    %c0_i32 = arith.constant 0 : i32
    %c0_i32_0 = arith.constant 0 : i32
    %c0_i32_1 = arith.constant 0 : i32
    return %c0_i32, %c0_i32_0 : i32, i32
  }
  func.func @transform_10(%arg0: i32) -> (i32, i32) {
    %c0_i32 = arith.constant 0 : i32
    %c0_i32_0 = arith.constant 0 : i32
    %c0_i32_1 = arith.constant 0 : i32
    return %c0_i32, %c0_i32_0 : i32, i32
  }
  func.func @transform_11(%arg0: i32) -> (i32, i32) {
    %c0_i32 = arith.constant 0 : i32
    %c0_i32_0 = arith.constant 0 : i32
    return %arg0, %c0_i32 : i32, i32
  }
}

</mosaic_0001>

<bundles_post_ra>
// kernel: tpu_custom_call.1
= control target key start
LH: loop header
LB: loop body
LE: loop exit
PB: predicated region body
PF: predicated region fallthrough
CT: control target
= control target key end

     0   :  { %vm52_vm0 = vcmask 261120   ;;  %s836_s0 = inlined_call_operand.vmem [shape: f32[16,32], index: 0, kind: input, shape index: {}]   ;;  %s837_s1 = inlined_call_operand.vmem [shape: f32[32,32], index: 1, kind: input, shape index: {}]   ;;  %s838_s2 = inlined_call_operand.vmem [shape: f32[1,32], index: 2, kind: input, shape index: {}]   ;;  %s839_s3 = inlined_call_operand.vmem [shape: f32[1,32], index: 3, kind: input, shape index: {}]   ;;  %s840_s4 = inlined_call_operand.vmem [shape: f32[1,32], index: 4, kind: input, shape index: {}]   ;;  %s841_s5 = inlined_call_operand.vmem [shape: f32[32,128], index: 5, kind: input, shape index: {}]   ;;  %s842_s6 = inlined_call_operand.vmem [shape: f32[1,128], index: 6, kind: input, shape index: {}]   ;;  %s843_s7 = inlined_call_operand.vmem [shape: f32[128,32], index: 7, kind: input, shape index: {}]   ;;  %s844_s8 = inlined_call_operand.vmem [shape: f32[1,32], index: 8, kind: input, shape index: {}]   ;;  %s845_s9 = inlined_call_operand.vmem [shape: f32[1,32], index: 9, kind: input, shape index: {}]   ;;  %s846_s10 = inlined_call_operand.vmem [shape: f32[1,32], index: 10, kind: input, shape index: {}]   ;;  %s847_s11 = inlined_call_operand.hbm [shape: f32[16,32], index: 11, kind: output, shape index: {}]  }
   0x1   :  { %v41_v0 = vld [vmem:[%s837_s1] sm:$0xff]  ;;  %v42_v1 = vld [vmem:[%s837_s1 + $0x8] sm:$0xff]  ;;  %v43_v2 = vld [vmem:[%s837_s1 + $0x10] sm:$0xff] }
   0x2   :  { %v551_v3 = vpack.c.bf16 %v42_v1, %v41_v0  ;;  %v44_v4 = vld [vmem:[%s837_s1 + $0x18] sm:$0xff]  ;;  %v716_v5 = vld [vmem:[%s836_s0] sm:$0xff] }
   0x3   :  { %v555_v6 = vpack.c.bf16 %v44_v4, %v43_v2  ;;  %502 = vmatprep.mubr.msk.f32.mxu1 %vm52_vm0, %v716_v5 }
   0x4   :  { %16 = vsyncpa [#allocation3], 0  ;;  %552 = vmatprep.subr.bf16.mxu1 %v551_v3  ;;  %v723_v7 = vld [vmem:[%s836_s0 + $0x8] sm:$0xff]  ;;  %v453_v8 = vld [vmem:[%s838_s2] ss:$0 sm:$0xff]  ;;  %s638_s29 = smov [#allocation2]  }
   0x5   :  { %554 = vmatpush3.bf16.msra.mxu1 %v551_v3  ;;  %v181_v27 = vld [vmem:[%s841_s5] sm:$0xff]  ;;  %v182_v28 = vld [vmem:[%s841_s5 + $0x8] sm:$0xff]  ;;  %v183_v30 = vld [vmem:[%s841_s5 + $0x10] sm:$0xff]  ;;  %s442_s0 = sshll.u32 %s638_s29, 4  ;;  %s443_s0 = int_to_ptr.vmem [resolvable:$true] %s442_s0 }
   0x6   :  { %556 = vmatprep.subr.bf16.mxu1 %v555_v6  ;;  %v559_v29 = vpack.c.bf16 %v182_v28, %v181_v27  ;;  %v184_v31 = vld [vmem:[%s841_s5 + $0x18] sm:$0xff]  ;;  %v456_v40 = vld [vmem:[%s839_s3] ss:$0 sm:$0xff]  ;;  %v292_v50 = vld [vmem:[%s843_s7 + $0x8] sm:$0xff]  ;;  %s614_s2 = scalar_lea.vmem %s443_s0, 256  ;;  %p619_p1 = scmp.lt.s32.totalorder %s443_s0, %s443_s0 }
   0x7   :  { %v563_v32 = vpack.c.bf16 %v184_v31, %v183_v30  ;;  %v457_v42 = vld [vmem:[%s840_s4] ss:$0 sm:$0xff]  ;;  %v293_v52 = vld [vmem:[%s843_s7 + $0x10] sm:$0xff]  ;;  %v294_v53 = vld [vmem:[%s843_s7 + $0x18] sm:$0xff]  ;;  %p615_p0 = scmp.ne.s32.totalorder %s443_s0, %s614_s2  ;;  %p620_p2 = scmp.lt.s32.totalorder %s614_s2, %s614_s2 }
   0x8   :  { %v291_v49 = vld [vmem:[%s843_s7] sm:$0xff]  ;;  %v571_v54 = vpack.c.bf16 %v294_v53, %v293_v52  ;;  %v296_v56 = vld [vmem:[%s843_s7 + $0x28] sm:$0xff]  ;;  %v297_v58 = vld [vmem:[%s843_s7 + $0x30] sm:$0xff] }
   0x9   :  { %558 = vmatpush3.bf16.msra.mxu1 %v555_v6  ;;  %v567_v51 = vpack.c.bf16 %v292_v50, %v291_v49  ;;  %v295_v55 = vld [vmem:[%s843_s7 + $0x20] sm:$0xff]  ;;  %v298_v59 = vld [vmem:[%s843_s7 + $0x38] sm:$0xff]  ;;  %v300_v62 = vld [vmem:[%s843_s7 + $0x48] sm:$0xff]  ;;  %p621_p3 = por %p620_p2, %p619_p1 }
   0xa   :  { %560 = vmatprep.subr.bf16.mxu1 %v559_v29  ;;  %v575_v57 = vpack.c.bf16 %v296_v56, %v295_v55  ;;  %v579_v60 = vpack.c.bf16 %v298_v59, %v297_v58  ;;  %v299_v61 = vld [vmem:[%s843_s7 + $0x40] sm:$0xff]  ;;  %v301_v63 = vld [vmem:[%s843_s7 + $0x50] sm:$0xff]  ;;  %v302_v1 = vld [vmem:[%s843_s7 + $0x58] sm:$0xff] }
   0xb   :  { %568 = vmatprep.subr.bf16.mxu0 %v567_v51  ;;  %v583_v0 = vpack.c.bf16 %v300_v62, %v299_v61  ;;  %v587_v2 = vpack.c.bf16 %v302_v1, %v301_v63  ;;  %v303_v3 = vld [vmem:[%s843_s7 + $0x60] sm:$0xff]  ;;  %v304_v4 = vld [vmem:[%s843_s7 + $0x68] sm:$0xff]  ;;  %p622_p4 = pnand %p621_p3, %p615_p0 }
   0xc   :  { %503 = vmatmul.mubr.msk.f32.vlgmr.msra.gmra.mrb[0].mxu1 %vm52_vm0, %v723_v7  ;;  %570 = vmatpush3.bf16.msra.mxu0 %v567_v51  ;;  %v591_v6 = vpack.c.bf16 %v304_v4, %v303_v3  ;;  %v462_v58 = vld [vmem:[%s845_s9] ss:$0 sm:$0xff] }
   0xd   :  { %562 = vmatpush3.bf16.msra.mxu1 %v559_v29  ;;  %572 = vmatprep.subr.bf16.mxu0 %v571_v54  ;;  %v463_v62 = vld [vmem:[%s846_s10] ss:$0 sm:$0xff] }
   0xe   :  { %564 = vmatprep.subr.bf16.mxu1 %v563_v32 }
  0x10   :  { %574 = vmatpush3.bf16.msra.mxu0 %v571_v54 }
  0x11   :  { %566 = vmatpush3.bf16.msra.mxu1 %v563_v32  ;;  %576 = vmatprep.subr.bf16.mxu0 %v575_v57 }
  0x14   :  { %578 = vmatpush3.bf16.msra.mxu0 %v575_v57 }
  0x15   :  { %580 = vmatprep.subr.bf16.mxu0 %v579_v60 }
  0x18   :  { %582 = vmatpush3.bf16.msra.mxu0 %v579_v60 }
  0x19   :  { %584 = vmatprep.subr.bf16.mxu0 %v583_v0 }
  0x1c   :  { %586 = vmatpush3.bf16.msra.mxu0 %v583_v0 }
  0x1d   :  { %588 = vmatprep.subr.bf16.mxu0 %v587_v2 }
  0x20   :  { %590 = vmatpush3.bf16.msra.mxu0 %v587_v2 }
  0x21   :  { %592 = vmatprep.subr.bf16.mxu0 %v591_v6 }
  0x24   :  { %594 = vmatpush3.bf16.msra.mxu0 %v591_v6 }
  0xdf   :  { %v504_v9 = vpop.f32.mrb[0].mxu1 }
  0xe0   :  { %v125_v10 = vpop.f32.mrb[1].mxu1  ;;  %v131_v11 = vadd.f32 %v504_v9, %v453_v8  ;;  %v306_v9 = vld [vmem:[%s843_s7 + $0x78] sm:$0xff] }
  0xe1   :  { %v126_v12 = vadd.f32 %v453_v8, %v125_v10  ;;  %v305_v8 = vld [vmem:[%s843_s7 + $0x70] sm:$0xff] }
  0xe2   :  { %v135_v15 = vadd.f32 %v131_v11, %v723_v7  ;;  %v595_v10 = vpack.c.bf16 %v306_v9, %v305_v8  ;;  %v458_v11 = vld [vmem:[%s842_s6] ss:$0 sm:$0xff] }
  0xe3   :  { %v134_v13 = vadd.f32 %v126_v12, %v716_v5 }
  0xe4   :  { %v141_v16 = vsel %vm52_vm0, %v135_v15, 0.0  ;;  %596 = vmatprep.subr.bf16.mxu0 %v595_v10 }
  0xe5   :  { %v138_v14 = vsel %vm52_vm0, %v134_v13, 0.0  ;;  %598 = vmatpush3.bf16.msra.mxu0 %v595_v10 }
  0xe6   :  { %139 = vadd.xlane.f32.xlu0 %v138_v14 }
  0xea   :  { %142 = vadd.xlane.f32.xlu0 %v141_v16 }
 0x173   :  { %v140_v17 = vpop.xlane.xlu0 %139 }
 0x174   :  { %v145_v18 = vmul.f32 0.03125, %v140_v17 }
 0x176   :  { %v147_v19 = vsub.f32 %v134_v13, %v145_v18 }
 0x177   :  { %v143_v20 = vpop.xlane.xlu0 %142 }
 0x178   :  { %v146_v21 = vmul.f32 0.03125, %v143_v20  ;;  %v149_v22 = vmul.f32 %v147_v19, %v147_v19 }
 0x17a   :  { %v148_v23 = vsub.f32 %v135_v15, %v146_v21  ;;  %v151_v24 = vsel %vm52_vm0, %v149_v22, 0.0 }
 0x17b   :  { %152 = vadd.xlane.f32.xlu1 %v151_v24 }
 0x17c   :  { %v150_v25 = vmul.f32 %v148_v23, %v148_v23 }
 0x17e   :  { %v154_v26 = vsel %vm52_vm0, %v150_v25, 0.0 }
 0x17f   :  { %155 = vadd.xlane.f32.xlu1 %v154_v26 }
 0x208   :  { %v153_v33 = vpop.xlane.xlu1 %152 }
 0x209   :  { %v157_v34 = vmul.f32 0.03125, %v153_v33 }
 0x20b   :  { %v159_v35 = vadd.f32 1e-05, %v157_v34  ;;  %v461_v34 = vld [vmem:[%s844_s8] ss:$0 sm:$0xff] }
 0x20c   :  { %v156_v36 = vpop.xlane.xlu1 %155 }
 0x20d   :  { %602 = vrsqrt.f32 %v159_v35  ;;  %v158_v37 = vmul.f32 0.03125, %v156_v36 }
 0x20f   :  { %v160_v38 = vadd.f32 1e-05, %v158_v37 }
 0x211   :  { %604 = vrsqrt.f32 %v160_v38 }
 0x217   :  { %v603_v39 = vpop.eup %602 }
 0x218   :  { %v163_v41 = vmul.f32 %v603_v39, %v147_v19 }
 0x21a   :  { %v171_v43 = vmul.f32 %v456_v40, %v163_v41 }
 0x21b   :  { %v605_v44 = vpop.eup %604 }
 0x21c   :  { %v164_v45 = vmul.f32 %v605_v44, %v148_v23  ;;  %v179_v46 = vadd.f32 %v457_v42, %v171_v43 }
 0x21e   :  { %v172_v47 = vmul.f32 %v456_v40, %v164_v45  ;;  %513 = vmatprep.mubr.msk.f32.mxu1 %vm52_vm0, %v179_v46 }
 0x220   :  { %v180_v48 = vadd.f32 %v457_v42, %v172_v47 }
 0x222   :  { %514 = vmatmul.mubr.msk.f32.vlgmr.msra.gmra.mrb[2].mxu1 %vm52_vm0, %v180_v48 }
 0x2f5   :  { %v515_v12 = vpop.f32.mrb[2].mxu1 }
 0x2f6   :  { %v270_v13 = vadd.f32 %v515_v12, %v458_v11  ;;  %v264_v14 = vpop.f32.mrb[3].mxu1 }
 0x2f7   :  { %v265_v15 = vadd.f32 %v458_v11, %v264_v14 }
 0x2f8   :  { %v274_v16 = vmul.f32 %v270_v13, %v270_v13 }
 0x2f9   :  { %v273_v17 = vmul.f32 %v265_v15, %v265_v15 }
 0x2fa   :  { %v276_v18 = vmul.f32 %v274_v16, %v270_v13 }
 0x2fb   :  { %v275_v19 = vmul.f32 %v273_v17, %v265_v15 }
 0x2fc   :  { %v278_v20 = vmul.f32 0.044715, %v276_v18 }
 0x2fd   :  { %v277_v21 = vmul.f32 0.044715, %v275_v19 }
 0x2fe   :  { %v280_v22 = vadd.f32 %v278_v20, %v270_v13 }
 0x2ff   :  { %v279_v23 = vadd.f32 %v277_v21, %v265_v15 }
 0x300   :  { %v282_v24 = vmul.f32 0.7978846, %v280_v22 }
 0x301   :  { %v281_v25 = vmul.f32 0.7978846, %v279_v23 }
 0x302   :  { %606 = vtanh.f32 %v282_v24 }
 0x303   :  { %608 = vtanh.f32 %v281_v25 }
 0x30c   :  { %v607_v26 = vpop.eup %606 }
 0x30d   :  { %v609_v27 = vpop.eup %608  ;;  %v286_v28 = vadd.f32 1.0, %v607_v26 }
 0x30e   :  { %v285_v29 = vadd.f32 1.0, %v609_v27 }
 0x30f   :  { %v288_v30 = vmul.f32 0.5, %v286_v28 }
 0x310   :  { %v287_v31 = vmul.f32 0.5, %v285_v29 }
 0x311   :  { %v290_v33 = vmul.f32 %v288_v30, %v270_v13 }
 0x312   :  { %v289_v32 = vmul.f32 %v287_v31, %v265_v15 }
 0x314   :  { %548 = vmatprep.mubr.f32.mxu0 %v289_v32 }
 0x315   :  { %549 = vmatmul.mubr.f32.vlgmr.msra.gmra.mrb[0].mxu0 %v290_v33 }
 0x3e8   :  { %v550_v35 = vpop.f32.mrb[0].mxu0 }
 0x3e9   :  { %v386_v36 = vadd.f32 %v550_v35, %v461_v34  ;;  %v380_v37 = vpop.f32.mrb[1].mxu0 }
 0x3ea   :  { %v381_v38 = vadd.f32 %v461_v34, %v380_v37 }
 0x3eb   :  { %v390_v39 = vadd.f32 %v386_v36, %v723_v7 }
 0x3ec   :  { %v389_v40 = vadd.f32 %v381_v38, %v716_v5 }
 0x3ed   :  { %v396_v41 = vsel %vm52_vm0, %v390_v39, 0.0 }
 0x3ee   :  { %397 = vadd.xlane.f32.xlu1 %v396_v41  ;;  %v393_v42 = vsel %vm52_vm0, %v389_v40, 0.0 }
 0x3ef   :  { %394 = vadd.xlane.f32.xlu0 %v393_v42 }
 0x47b   :  { %v398_v43 = vpop.xlane.xlu1 %397 }
 0x47c   :  { %v400_v44 = vmul.f32 0.03125, %v398_v43  ;;  %v395_v45 = vpop.xlane.xlu0 %394 }
 0x47d   :  { %v399_v46 = vmul.f32 0.03125, %v395_v45 }
 0x47e   :  { %v402_v47 = vsub.f32 %v390_v39, %v400_v44 }
 0x47f   :  { %v401_v48 = vsub.f32 %v389_v40, %v399_v46 }
 0x480   :  { %v404_v49 = vmul.f32 %v402_v47, %v402_v47 }
 0x481   :  { %v403_v50 = vmul.f32 %v401_v48, %v401_v48 }
 0x482   :  { %v408_v51 = vsel %vm52_vm0, %v404_v49, 0.0 }
 0x483   :  { %409 = vadd.xlane.f32.xlu1 %v408_v51  ;;  %v405_v7 = vsel %vm52_vm0, %v403_v50, 0.0 }
 0x484   :  { %406 = vadd.xlane.f32.xlu0 %v405_v7 }
 0x510   :  { %v410_v5 = vpop.xlane.xlu1 %409 }
 0x511   :  { %v412_v52 = vmul.f32 0.03125, %v410_v5  ;;  %v407_v53 = vpop.xlane.xlu0 %406 }
 0x512   :  { %v411_v54 = vmul.f32 0.03125, %v407_v53 }
 0x513   :  { %v414_v55 = vadd.f32 1e-05, %v412_v52 }
 0x514   :  { %v413_v56 = vadd.f32 1e-05, %v411_v54 }
 0x515   :  { %610 = vrsqrt.f32 %v414_v55 }
 0x516   :  { %612 = vrsqrt.f32 %v413_v56 }
 0x51f   :  { %v611_v57 = vpop.eup %610 }
 0x520   :  { %v613_v59 = vpop.eup %612  ;;  %v418_v60 = vmul.f32 %v611_v57, %v402_v47 }
 0x521   :  { %v417_v61 = vmul.f32 %v613_v59, %v401_v48 }
 0x522   :  { %v426_v63 = vmul.f32 %v462_v58, %v418_v60 }
 0x523   :  { %v425_v0 = vmul.f32 %v462_v58, %v417_v61 }
 0x524   :  { %v434_v1 = vadd.f32 %v463_v62, %v426_v63 }
 0x525   :  { %v433_v2 = vadd.f32 %v463_v62, %v425_v0 }
 0x526   :  { %436 = vst.msk [vmem:[#allocation2 + $0x8] sm:$0xff] %vm52_vm0, %v434_v1 }
 0x527   :  { %435 = vst.msk [vmem:[#allocation2] sm:$0xff] %vm52_vm0, %v433_v2 }
 0x528   :  { %625 = shalt.err (!%p622_p4)
}
 0x529   :  { %s626_s30 = scalar_lea.hbm %s847_s11, 256 }
 0x52a   :  { %p627_p5 = scmp.ne.s32.totalorder %s847_s11, %s626_s30  ;;  %p630_p6 = scmp.lt.u32.totalorder %s626_s30, %s847_s11 }
 0x52c   :  { %p632_p7 = pnand %p630_p6, %p627_p5 }
 0x52e   :  { %635 = shalt.err (!%p632_p7)
}
 0x52f   :  { %s639_s16 = smov 128   ;;  %s640_s17 = smov 8  }
 0x530   :  { %448 = dma.vmem_to_hbm [thread:$0]  %s443_s0, 256, %s847_s11, [#allocation3], %s639_s16, %s639_s16, %s640_s17  }
 0x531   :  { %636 = dma.done.wait [#allocation3], 256  }
 0x532   :  { %637 = vsyncadd [#allocation3], 4294967040 }
 0x533   :  { %452 = vsyncpa [#allocation3], 1 }

</bundles_post_ra>
